<compile_context>
chip_gen: v7x
topology: tpu7x:2x2x1
jax: 0.10.0
libtpu: 0.0.40
codegen_flags: <defaults>
</compile_context>

<pallas_src>
import jax
import jax.numpy as jnp
from jax.experimental import pallas as pl
from jax.experimental.pallas import tpu as pltpu


def _make_linear_kernel(compute_dtype):
    def _linear_kernel(w_ref, x_ref, o_ref):
        # w_ref: (C_out, C_in) resident weight tile
        # x_ref: (C_in, TS)    spatial tile of one image (channels x spatial)
        # o_ref: (C_out, TS)
        w = w_ref[...]
        x = x_ref[...]
        if compute_dtype is not None:
            # In-kernel cast: keeps MXU on its native low-precision path without
            # an extra HBM pass. NOTE: bf16 inputs give ~1e-2 relative deviation
            # vs the f32 PyTorch reference (accumulation stays f32).
            w = w.astype(compute_dtype)
            x = x.astype(compute_dtype)
        o_ref[...] = jnp.dot(
            w, x, preferred_element_type=jnp.float32
        ).astype(o_ref.dtype)

    return _linear_kernel


def _vmem_capacity_bytes():
    """Best-effort trace-time VMEM query; conservative (v7x) fallback."""
    try:
        cap = getattr(pltpu.get_tpu_info(), "vmem_capacity_bytes", None)
        if cap:
            return int(cap)
    except Exception:
        pass
    return 64 * 1024 * 1024  # v7x per-TC capacity: safe lower bound everywhere


def _choose_spatial_tile(c_in, hw, itemsize, n_batch, target_block_bytes):
    """Spatial tile: multiple of 128, ~target bytes per x-block, DMA-friendly."""
    # Keep each per-channel contiguous DMA run >= 8 KiB for HBM streaming eff.
    min_ts = max(128, ((8192 // itemsize) // 128) * 128)
    ts = target_block_bytes // max(1, c_in * itemsize)
    ts = max(min_ts, (ts // 128) * 128)
    if ts >= hw:
        if n_batch == 1 and hw >= 256:
            # Single-image call would otherwise be a 1-block grid: split the
            # spatial axis so v7x's second TensorCore gets work.
            ts = max(128, ((hw // 2) // 128) * 128)
        else:
            ts = hw  # full-extent block (exempt from 128-divisibility rule)
    return ts


def linear_layer_forward(
    x_nchw,
    weight,
    *,
    spatial_tile=None,
    compute_dtype=None,
    x_buffer_count=None,
):
    """1x1 conv (no bias) via a Pallas W @ X matmul in native NCHW layout.

    x_nchw: (N, C_in, H, W)
    weight: (C_out, C_in) or the raw conv weight (C_out, C_in, 1, 1)
    x_buffer_count: optional pipeline depth for the activation stream
      (e.g. 3 on v5e/v6e to hide strided-DMA issue latency; leave None on v7x).
    returns: (N, C_out, H, W) in x's dtype
    """
    if weight.ndim == 4:  # accept the PyTorch Conv2d weight shape directly
        weight = weight.reshape(weight.shape[0], weight.shape[1])

    N, C_in, H, W = x_nchw.shape
    C_out = weight.shape[0]
    HW = H * W
    out_dtype = x_nchw.dtype

    # Free (metadata-only) reshape: NCHW is already contiguous as (N, C_in, HW).
    x = x_nchw.reshape(N, C_in, HW)

    x_itemsize = jnp.dtype(x.dtype).itemsize
    w_itemsize = jnp.dtype(weight.dtype).itemsize
    out_itemsize = jnp.dtype(out_dtype).itemsize

    vmem_cap = _vmem_capacity_bytes()
    target_block_bytes = max(2 * 1024 * 1024, vmem_cap // 8)

    if spatial_tile is not None:
        # Validate caller override: multiple of 128 (required by the (8,128)
        # BlockSpec rule unless full-extent), at least 128.
        ts = max(128, (int(spatial_tile) // 128) * 128)
        if ts >= HW:
            ts = HW
    else:
        ts = _choose_spatial_tile(C_in, HW, x_itemsize, N, target_block_bytes)

    grid_s = 1 if ts == HW else pl.cdiv(HW, ts)

    # Derive the scoped-VMEM limit from the actual block footprint (explicit
    # limit is load-bearing on v5e's 16 MiB default), capped well under the
    # physical capacity of the current generation.
    x_block_bytes = C_in * ts * x_itemsize
    out_block_bytes = C_out * ts * out_itemsize
    vmem_limit = min(
        int(vmem_cap * 3 // 4),
        max(32 * 1024 * 1024, 3 * (x_block_bytes + out_block_bytes) + (4 << 20)),
    )

    x_spec_kwargs = {}
    if x_buffer_count is not None:
        x_spec_kwargs["pipeline_mode"] = pl.Buffered(int(x_buffer_count))

    cost = pl.CostEstimate(
        flops=2 * N * C_out * C_in * HW,
        transcendentals=0,
        bytes_accessed=(
            N * C_in * HW * x_itemsize
            + N * C_out * HW * out_itemsize
            + C_out * C_in * w_itemsize
        ),
    )

    y = pl.pallas_call(
        _make_linear_kernel(compute_dtype),
        out_shape=jax.ShapeDtypeStruct((N, C_out, HW), out_dtype),
        grid_spec=pltpu.PrefetchScalarGridSpec(
            num_scalar_prefetch=0,
            grid=(N, grid_s),
            in_specs=[
                # Tiny weight: constant index_map -> stays resident in VMEM.
                pl.BlockSpec((C_out, C_in), lambda n, s: (0, 0)),
                # Activation tile: batch squeezed, channels full, spatial tiled.
                pl.BlockSpec((None, C_in, ts), lambda n, s: (n, 0, s),
                             **x_spec_kwargs),
            ],
            out_specs=pl.BlockSpec((None, C_out, ts), lambda n, s: (n, 0, s)),
        ),
        compiler_params=pltpu.CompilerParams(
            dimension_semantics=("parallel", "parallel"),
            vmem_limit_bytes=vmem_limit,
        ),
        cost_estimate=cost,
    )(weight, x)

    # Free reshape back to NCHW image form.
    return y.reshape(N, C_out, H, W)


if __name__ == "__main__":
    key = jax.random.PRNGKey(0)
    k_x, k_w = jax.random.split(key)

    N, C_in, H, W = 2, 4, 16, 16
    C_out = 1

    x = jax.random.normal(k_x, (N, C_in, H, W), dtype=jnp.float32)
    # Deterministic synthetic weight for Conv2d(C_in, C_out, 1, 1, bias=False)
    weight = jax.random.normal(k_w, (C_out, C_in), dtype=jnp.float32) * 0.1

    y = linear_layer_forward(x, weight)
    y = jax.block_until_ready(y)

    # Reference check (plain JAX einsum == 1x1 conv). NOTE: run with
    # compute_dtype=None here; bf16 compute would need ~1e-2 rel tolerance.
    y_ref = jnp.einsum("nchw,oc->nohw", x, weight)
    assert y.shape == (N, C_out, H, W)
    assert jnp.allclose(y, y_ref, atol=1e-5, rtol=1e-5)

    print("KERNEL_OK")
</pallas_src>

<mosaic_0001>
module attributes {stable_mosaic.version = 11 : i64} {
  func.func @_linear_kernel(%arg0: i32, %arg1: i32, %arg2: memref<1x4xf32, #tpu.memory_space<vmem>>, %arg3: memref<1x4x256xf32, #tpu.memory_space<vmem>>, %arg4: memref<1x1x256xf32, #tpu.memory_space<vmem>>) attributes {dimension_semantics = [#tpu.dimension_semantics<parallel>, #tpu.dimension_semantics<parallel>], iteration_bounds = array<i64: 2, 1>, scalar_prefetch = 0 : i64, scratch_operands = 0 : i64, tpu.core_type = #tpu.core_type<tc>, window_params = [{pipeline_mode = #tpu.pipeline_mode<synchronous>, transform_indices = @transform_0, window_bounds = array<i64: 1, 4>}, {transform_indices = @transform_1, window_bounds = array<i64: 1, 4, 256>}, {transform_indices = @transform_2, window_bounds = array<i64: 1, 1, 256>}]} {
    %c0 = arith.constant 0 : index
    %c0_0 = arith.constant 0 : index
    %0 = vector.load %arg2[%c0, %c0_0] : memref<1x4xf32, #tpu.memory_space<vmem>>, vector<1x4xf32>
    %c0_1 = arith.constant 0 : index
    %c0_2 = arith.constant 0 : index
    %c0_3 = arith.constant 0 : index
    %1 = vector.load %arg3[%c0_1, %c0_2, %c0_3] : memref<1x4x256xf32, #tpu.memory_space<vmem>>, vector<1x4x256xf32>
    %2 = vector.shape_cast %1 : vector<1x4x256xf32> to vector<4x256xf32>
    %cst = arith.constant dense<0.000000e+00> : vector<1x256xf32>
    %3 = tpu.matmul %0, %2, %cst {dimension_numbers = #tpu.dot_dimension_numbers<[1], [0], [0], [1], [0, 0, 1, 1], [], []>} : vector<1x4xf32>, vector<4x256xf32>, vector<1x256xf32> -> vector<1x256xf32>
    %c0_4 = arith.constant 0 : index
    %c0_5 = arith.constant 0 : index
    %c0_6 = arith.constant 0 : index
    %4 = vector.load %arg4[%c0_4, %c0_5, %c0_6] : memref<1x1x256xf32, #tpu.memory_space<vmem>>, vector<1x1x256xf32>
    %5 = vector.shape_cast %4 : vector<1x1x256xf32> to vector<1x256xf32>
    %6 = vector.shape_cast %3 : vector<1x256xf32> to vector<1x1x256xf32>
    tpu.vector_store %arg4[%c0_4, %c0_5, %c0_6], %6 {strides = array<i32>} : memref<1x1x256xf32, #tpu.memory_space<vmem>>, vector<1x1x256xf32>,
    return
  }
  func.func @transform_0(%arg0: i32, %arg1: i32) -> (i32, i32) {
    %c0_i32 = arith.constant 0 : i32
    %c0_i32_0 = arith.constant 0 : i32
    %c0_i32_1 = arith.constant 0 : i32
    return %c0_i32, %c0_i32_0 : i32, i32
  }
  func.func @transform_1(%arg0: i32, %arg1: i32) -> (i32, i32, i32) {
    %c0_i32 = arith.constant 0 : i32
    %c0_i32_0 = arith.constant 0 : i32
    return %arg0, %c0_i32, %arg1 : i32, i32, i32
  }
  func.func @transform_2(%arg0: i32, %arg1: i32) -> (i32, i32, i32) {
    %c0_i32 = arith.constant 0 : i32
    %c0_i32_0 = arith.constant 0 : i32
    return %arg0, %c0_i32, %arg1 : i32, i32, i32
  }
}

</mosaic_0001>

<bundles_post_ra>
// kernel: tpu_custom_call.1
= control target key start
LH: loop header
LB: loop body
LE: loop exit
PB: predicated region body
PF: predicated region fallthrough
CT: control target
= control target key end

     0   :  { %7 = vsyncpa [#allocation3], 0  ;;  %s894_s0 = inlined_call_operand.hbm [shape: f32[1,4], index: 0, kind: input, shape index: {}]   ;;  %s895_s1 = inlined_call_operand.hbm [shape: f32[2,4,256], index: 1, kind: input, shape index: {}]   ;;  %s896_s2 = inlined_call_operand.hbm [shape: f32[2,1,256], index: 2, kind: output, shape index: {}]  }
   0x1   :  { %8 = vsyncpa [#allocation6], 0 }
   0x2   :  { %10 = vsyncpa [#allocation6 + $0x1], 0 }
   0x3   :  { %11 = vsyncpa [#allocation4], 0 }
   0x4   :  { %13 = vsyncpa [#allocation4 + $0x1], 0  ;;  %s677_s9 = smov 0   ;;  %s679_s10 = smov 0  }
   0x5   :  { %s681_s11 = smov 0   ;;  %s683_s12 = smov 0  }
   0x6   :  { %s685_s13 = smov 0   ;;  %s687_s14 = smov 0  }
   0x7 LB: > { %s413_s15 = sadd.s32 4294967295, %s655_s14   ;;  %s414_s16 = sadd.s32 4294967294, %s655_s14   ;;  %s655_s14 = sphi %s687_s14, %s19_s14   ;;  %s651_s13 = sphi %s685_s13, %s921_s13   ;;  %s647_s12 = sphi %s683_s12, %s920_s12   ;;  %s643_s11 = sphi %s681_s11, %s919_s11   ;;  %s639_s10 = sphi %s679_s10, %s918_s10   ;;  %s635_s9 = sphi %s677_s9, %s917_s9  }
   0x8   : > { %p74_p0 = scmp.ne.s32.totalorder %s639_s10, %s635_s9  ;;  %p711_p1 = scmp.eq.s32.totalorder %s413_s15, 0 }
   0x9   : > { %p715_p2 = scmp.eq.s32.totalorder %s413_s15, 1  ;;  %p106_p3 = scmp.eq.s32.totalorder %s414_s16, 1 }
   0xa   : > { %s901_s17 = scalar_select %p711_p1, 1, 0 }
   0xb   : > { %s902_s18 = scalar_select %p715_p2, 1, 0 }
   0xc   : > { %p721_p4 = por %p711_p1, %p74_p0  ;;  %p415_p5 = scmp.ge.s32.totalorder %s655_s14, 1 }
   0xd   : > { %p726_p6 = por %p106_p3, %p74_p0  ;;  %p113_p7 = scmp.lt.s32.totalorder %s655_s14, 3 }
   0xe   : > { %s903_s19 = scalar_select %p721_p4, 1, 0 }
   0xf   : > { %s904_s20 = scalar_select %p726_p6, 1, 0 }
  0x10   : > { %p731_p8 = pnand %p415_p5, %p113_p7  ;;  %s657_s22 = smov [#allocation2]  }
  0x11   : > { %s126_s23 = sshll.u32 %s657_s22, 4  ;;  %s31_s25 = sadd.s32 1, %s651_s13  ;;  %s127_s23 = int_to_ptr.vmem [resolvable:$true] %s126_s23 }
  0x12   : > { %s905_s21 = scalar_select %p731_p8, 1, 0 }
  0x13   : > { %p443_p10 = pneg %p731_p8  ;;  %s61_s26 = sadd.s32 1, %s643_s11 }
  0x14   : > { %p746_p12 = scmp.ge.s32.totalorder %s31_s25, 2  ;;  %s511_s30 = scalar_lea.hbm %s894_s0, 16 }
  0x15   : > { %p740_p11 = pnand %p443_p10, %p711_p1  ;;  %p512_p13 = scmp.ne.s32.totalorder %s894_s0, %s511_s30 }
  0x16   : > { %s907_s27 = scalar_select %p746_p12, 1, 0 }
  0x17   : > { %p513_p0 = pneg %p740_p11  ;;  %p518_p7 = scmp.lt.u32.totalorder %s511_s30, %s894_s0 }
  0x19   : > { %p514_p3 = pnand %p513_p0, %p512_p13 }
  0x1b   : > { %p515_p5 = pneg %p514_p3 }
  0x1d   : > { %p520_p10 = pnand %p518_p7, %p515_p5 }
  0x1f   : > { %523 = shalt.err (!%p520_p10)
}
  0x20   : > { %s524_s7 = scalar_lea.vmem %s127_s23, 16  ;;  %s531_s8 = scalar_lea.vmem %s127_s23, 32 }
  0x21   : > { %p525_p9 = scmp.ne.s32.totalorder %s127_s23, %s524_s7  ;;  %p532_p1 = scmp.lt.s32.totalorder %s127_s23, %s127_s23 }
  0x22   : > { %p533_p8 = scmp.lt.s32.totalorder %s531_s8, %s524_s7 }
  0x23   : > { %p527_p6 = pnand %p525_p9, %p513_p0 }
  0x24   : > { %p534_p2 = por %p533_p8, %p532_p1 }
  0x25   : > { %p528_p4 = pneg %p527_p6 }
  0x27   : > { %p535_p12 = pnand %p534_p2, %p528_p4 }
  0x29   : > { %538 = shalt.err (!%p535_p12)
}
  0x2a   : > { %446 = dma.hbm_to_vmem [thread:$0]  (!%p740_p11), %s894_s0, 16, %s127_s23, [#allocation3]  }
  0x2b   : > { %p908_p1 = scmp.ne.s32.totalorder %s907_s27, 0  ;;  %p68_p2 = scmp.ne.s32.totalorder %s643_s11, %s639_s10 }
  0x2c   : > { %p69_p4 = scmp.eq.s32.totalorder %s655_s14, 0  ;;  %p456_p6 = scmp.lt.s32.totalorder %s655_s14, 2 }
  0x2d   : > { %s923_s25 = smov (%p908_p1, %s31_s25), 0  ;;  %p909_p12 = scmp.ne.s32.totalorder %s902_s18, 0 }
  0x2e   : > { %s56_s22 = ssub.s32 %s651_s13, %s923_s25  ;;  %p70_p9 = por %p69_p4, %p68_p2 }
  0x2f   : > { %p59_p8 = scmp.eq.s32.totalorder %s56_s22, 0  ;;  %p778_p13 = por %p909_p12, %p68_p2 }
  0x30   : > { %s137_s28 = sand.u32 1, %s643_s11   ;;  %s433_s27 = sshll.u32 %s651_s13, 7 }
  0x31   : > { %s786_s29 = scalar_select %p59_p8, %s643_s11, %s61_s26  }
  0x32   : > { %s418_s23 = sshll.u32 %s137_s28, 3  ;;  %s792_s4 = scalar_lea.hbm %s895_s1, %s433_s27 }
  0x33   : > { %s141_s18 = scalar_lea.vmem [#allocation5], %s418_s23  ;;  %p796_p11 = pnand %p456_p6, %p70_p9 }
  0x34   : > { %s151_s5 = sshll.u32 %s141_s18, 4  ;;  %s138_s26 = scalar_lea.sflag [#allocation6], %s137_s28  ;;  %s794_s5 = int_to_ptr.vmem [resolvable:$true] %s151_s5 }
  0x35   : > { %s539_s7 = scalar_lea.hbm %s792_s4, 128  ;;  %p541_p3 = pneg %p796_p11 }
  0x36   : > { %p540_p0 = scmp.ne.s32.totalorder %s792_s4, %s539_s7  ;;  %s544_s16 = scalar_lea.hbm %s895_s1, 256 }
  0x37   : > { %p545_p10 = scmp.lt.u32.totalorder %s792_s4, %s895_s1  ;;  %p546_p1 = scmp.lt.u32.totalorder %s544_s16, %s539_s7 }
  0x38   : > { %p542_p5 = pnand %p541_p3, %p540_p0  ;;  %p548_p4 = scmp.lt.u32.totalorder %s539_s7, %s792_s4 }
  0x39   : > { %p547_p2 = por %p546_p1, %p545_p10 }
  0x3a   : > { %p543_p7 = pneg %p542_p5 }
  0x3b   : > { %p549_p6 = por %p548_p4, %p547_p2 }
  0x3d   : > { %p550_p8 = pnand %p549_p6, %p543_p7 }
  0x3f   : > { %553 = shalt.err (!%p550_p8)
}
  0x40   : > { %s554_s28 = scalar_lea.vmem %s794_s5, 128  ;;  %s658_s27 = smov [#allocation5]  }
  0x41   : > { %p555_p9 = scmp.ne.s32.totalorder %s794_s5, %s554_s28  ;;  %s559_s30 = sshll.u32 %s658_s27, 4  ;;  %s560_s30 = int_to_ptr.vmem [resolvable:$false] %s559_s30 }
  0x42   : > { %s561_s3 = scalar_lea.vmem %s560_s30, 256  ;;  %p562_p5 = scmp.lt.s32.totalorder %s794_s5, %s560_s30 }
  0x43   : > { %p557_p12 = pnand %p555_p9, %p541_p3  ;;  %p563_p10 = scmp.lt.s32.totalorder %s561_s3, %s554_s28 }
  0x45   : > { %p558_p0 = pneg %p557_p12  ;;  %p564_p1 = por %p563_p10, %p562_p5 }
  0x47   : > { %p565_p2 = pnand %p564_p1, %p558_p0 }
  0x49   : > { %568 = shalt.err (!%p565_p2)
}
  0x4a   : > { %450 = dma.hbm_to_vmem [thread:$0]  (!%p796_p11), %s792_s4, 128, %s794_s5, %s138_s26  }
  0x4b   : > { %p912_p7 = scmp.ne.s32.totalorder %s905_s21, 0 }
  0x4c   : > { %p913_p3 = scmp.ne.s32.totalorder (!%p912_p7), %s901_s17, 0 }
  0x4d   : > { %160 = sbr.rel (%p912_p7) target bundleno = 327 (0x147), region = 28 }
  0x54   : > { %622 = dma.done.wait (%p913_p3), [#allocation3], 16  }
  0x55   : > { %624 = vsyncadd (%p913_p3), [#allocation3], 4294967280  ;;  %s832_s18 = sand.u32 1, %s639_s10   ;;  %p914_p4 = scmp.ne.s32.totalorder %s903_s19, 0 }
  0x56   : > { %s423_s7 = sshll.u32 %s832_s18, 3  ;;  %s167_s6 = scalar_lea.sflag [#allocation6], %s832_s18 }
  0x57   : > { %s170_s8 = scalar_lea.vmem [#allocation5], %s423_s7 }
  0x58   : > { %626 = dma.done.wait (%p914_p4), %s167_s6, 128  }
  0x59   : > { %628 = vsyncadd (%p914_p4), %s167_s6, 4294967168  ;;  %v659_v0 = vmov 0.0   ;;  %v194_v1 = vld [vmem:[%s170_s8] sm:$0xff]  ;;  %vm201_vm0 = vcmask 1043456   ;;  %v193_v3 = vld [vmem:[#allocation2] sm:$0x1]  ;;  %v283_v6 = vlaneseq }
  0x5a   : > { %270 = vmatprep.mubr.f32.mxu0 %v659_v0  ;;  %v196_v2 = vcombine.high %v194_v1, %v194_v1  ;;  %vm197_vm1 = vcmask 31744   ;;  %v660_v4 = vmov 1966171168   ;;  %s424_s17 = sshll.u32 %s832_s18, 1  ;;  %s434_s19 = sshll.u32 %s647_s12, 5 }
  0x5b   : > { %v281_v5 = vunpack.c.l.s4 %v660_v4  ;;  %v284_v8 = vshrl.u32 %v283_v6, 7  ;;  %s190_s21 = scalar_lea.vmem [#allocation7], %s424_s17  ;;  %vm297_vm2 = vcmp.lt.s32.totalorder %v283_v6, 256  ;;  %s845_s15 = scalar_lea.hbm %s896_s2, %s434_s19 }
  0x5c   : > { %425 = vmatprep.subr.msk.mxu0 %vm201_vm0, %v196_v2  ;;  %s317_s4 = sshll.u32 %s190_s21, 4  ;;  %s301_s16 = scalar_lea.sflag [#allocation4], %s832_s18  ;;  %s847_s4 = int_to_ptr.vmem [resolvable:$true] %s317_s4 }
  0x5d   : > { %426 = vmatpush1.msk.msra.mxu0 %vm201_vm0, %v194_v1  ;;  %v282_v7 = vunpack.c.0.s8 %v281_v5  ;;  %s569_s22 = scalar_lea.vmem %s847_s4, 32  ;;  %s661_s12 = smov [#allocation7]  }
  0x5e   : > { %427 = vmatmul.mubr.msk.f32.vlgmr.msra.gmra.mrb[0].mxu0 %vm197_vm1, %v193_v3  ;;  %p570_p11 = scmp.ne.s32.totalorder %s847_s4, %s569_s22  ;;  %s573_s23 = sshll.u32 %s661_s12, 4  ;;  %s574_s23 = int_to_ptr.vmem [resolvable:$false] %s573_s23 }
  0x5f   : > { %v285_v10 = vsub.s32 %v282_v7, %v284_v8  ;;  %s575_s28 = scalar_lea.vmem %s574_s23, 64  ;;  %p576_p9 = scmp.lt.s32.totalorder %s847_s4, %s574_s23 }
  0x60   : > { %p571_p6 = pnand %p570_p11, %p778_p13  ;;  %p577_p12 = scmp.lt.s32.totalorder %s575_s28, %s569_s22 }
  0x62   : > { %p572_p8 = pneg %p571_p6  ;;  %p578_p0 = por %p577_p12, %p576_p9 }
  0x64   : > { %p579_p5 = pnand %p578_p0, %p572_p8 }
 0x131   : > { %v272_v9 = vpop.f32.mrb[0].mxu0 }
 0x132   : > { %v274_v11 = vpop.f32.mrb[1].mxu0 }
 0x133   : > { %v279_v12 = vcombine.low %v272_v9, %v274_v11 }
 0x135   : > { %v286_v13 = vrot.slane %v279_v12, %v285_v10 }
 0x137   : > { %v293_v14 = vrot.slane %v286_v13, %v285_v10 }
 0x139   : > { %299 = vst.msk [vmem:[%s190_s21] sm:$0x3] %vm297_vm2, %v293_v14 }
 0x13a   : > { %582 = shalt.err (!%p579_p5)
}
 0x13b   : > { %s583_s27 = scalar_lea.hbm %s845_s15, 32  ;;  %s587_s18 = scalar_lea.hbm %s896_s2, 64 }
 0x13c   : > { %p584_p10 = scmp.ne.s32.totalorder %s845_s15, %s583_s27  ;;  %p588_p7 = scmp.lt.u32.totalorder %s845_s15, %s896_s2 }
 0x13d   : > { %p589_p3 = scmp.lt.u32.totalorder %s587_s18, %s583_s27  ;;  %p591_p11 = scmp.lt.u32.totalorder %s583_s27, %s845_s15 }
 0x13e   : > { %p585_p1 = pnand %p584_p10, %p778_p13 }
 0x13f   : > { %p590_p4 = por %p589_p3, %p588_p7 }
 0x140   : > { %p586_p2 = pneg %p585_p1 }
 0x141   : > { %p592_p6 = por %p591_p11, %p590_p4 }
 0x143   : > { %p593_p8 = pnand %p592_p6, %p586_p2 }
 0x145   : > { %596 = shalt.err (!%p593_p8)
}
 0x146   : > { %441 = dma.vmem_to_hbm [thread:$0]  (%p778_p13), %s847_s4, 32, %s845_s15, %s301_s16  }
 0x147 PF: > { %s329_s8 = sand.u32 1, %s635_s9   ;;  %p915_p9 = scmp.ne.s32.totalorder %s904_s20, 0 }
 0x148   : > { %p916_p12 = scmp.ge.s32.totalorder %s655_s14, 2  ;;  %s330_s17 = scalar_lea.sflag [#allocation4], %s329_s8 }
 0x14a   : > { %p452_p0 = pnand %p916_p12, %p915_p9 }
 0x14c   : > { %630 = dma.done.wait (!%p452_p0), %s330_s17, 32  }
 0x14d   : > { %632 = vsyncadd (!%p452_p0), %s330_s17, 4294967264  ;;  %s19_s14 = sadd.s32 1, %s655_s14   ;;  %s917_s9 = smov %s639_s10 }
 0x14e   : > { %p16_p5 = scmp.ge.s32.totalorder %s19_s14, 4   ;;  %s918_s10 = smov %s643_s11 }
 0x14f   : > { %s919_s11 = smov %s786_s29  ;;  %s920_s12 = smov %s651_s13 }
 0x150   : > { %s921_s13 = smov %s923_s25  ;;  %18 = sbr.rel (!%p16_p5) target bundleno = 7 (0x7), region = 78 }
 0x157   :  { %335 = vsyncpa [#allocation3], 1 }
 0x158   :  { %337 = vsyncpa [#allocation3 + $0x1], 1 }
 0x159   :  { %338 = vsyncpa [#allocation6], 1 }
 0x15a   :  { %340 = vsyncpa [#allocation6 + $0x1], 1 }
 0x15b   :  { %341 = vsyncpa [#allocation4], 1 }
 0x15c   :  { %343 = vsyncpa [#allocation4 + $0x1], 1 }

</bundles_post_ra>
